<compile_context>
chip_gen: v5e
topology: v5e:2x2
jax: 0.10.0
libtpu: 0.0.40
codegen_flags: <defaults>
</compile_context>

<pallas_src>
import functools

import jax
import jax.numpy as jnp
from jax.experimental import pallas as pl
from jax.experimental.pallas import tpu as pltpu


def _ce_label_smooth_kernel(
    x_ref, t_ref, o_ref, *, epsilon, num_classes, batch_size, tile_b, has_tail
):
    # x_ref: (TILE_B, C) logits block, t_ref: (TILE_B, 1) int32 labels block,
    # o_ref: (1, 1) f32 partial sum for this block (SMEM).
    x = x_ref[...].astype(jnp.float32)
    tb, c = x.shape  # static

    # Per-row logsumexp.
    m = jnp.max(x, axis=-1, keepdims=True)
    z = m + jnp.log(jnp.sum(jnp.exp(x - m), axis=-1, keepdims=True))

    # Fused smoothed-target weighted reduction.  With
    #   w_j = eps/C + (1 - eps) * [j == t_i]   (so sum_j w_j = 1),
    #   loss_i = sum_j w_j * (Z_i - x_ij) = Z_i - sum_j w_j * x_ij.
    cls_idx = jax.lax.broadcasted_iota(jnp.int32, (tb, c), dimension=1)
    on_w = 1.0 - epsilon + epsilon / num_classes
    off_w = epsilon / num_classes
    w = jnp.where(cls_idx == t_ref[...], on_w, off_w)
    row_loss = z - jnp.sum(w * x, axis=-1, keepdims=True)

    if has_tail:
        # Mask only the (TILE_B, 1) per-row loss of padded tail rows.  Garbage
        # in padded rows cannot leak into valid rows: every reduction above is
        # per-row, and jnp.where does not propagate the unselected branch.
        i = pl.program_id(0)
        rows = jax.lax.broadcasted_iota(jnp.int32, (tb, 1), dimension=0)
        valid = rows + i * tile_b < batch_size
        row_loss = jnp.where(valid, row_loss, 0.0)

    o_ref[0, 0] = jnp.sum(row_loss)


def cross_entropy_label_smooth(
    inputs,
    targets,
    *,
    num_classes,
    epsilon=0.1,
    max_tile_rows=2048,
    vmem_budget_bytes=40 * 1024 * 1024,
):
    """inputs: (B, num_classes) float logits (bf16 recommended, esp. on v5e);
    targets: (B,) int class indices.  Returns the scalar smoothed CE loss."""
    b, c = inputs.shape
    assert c == num_classes
    targets_2d = targets.astype(jnp.int32).reshape(b, 1)
    itemsize = jnp.dtype(inputs.dtype).itemsize

    # Per-row VMEM footprint:
    #   2x double-buffered (tile_b, C) logits input blocks,
    #   2x double-buffered (tile_b, 1) int32 targets blocks (lane-padded to 128),
    #   ~3x (tile_b, C) f32 in-kernel working set (x_f32 / exp / w*x temporaries).
    bytes_per_row = 2 * c * itemsize + 2 * 128 * 4 + 3 * c * 4
    rows_fit = max(8, vmem_budget_bytes // bytes_per_row)
    tile_b = min(int(max_tile_rows), int(rows_fit))
    tile_b = max(8, (tile_b // 8) * 8)  # (8, 128) tiling: sublane multiple of 8

    if b >= 512:
        # Guarantee >= 2 grid blocks when B is large so the "parallel" row axis
        # can be sharded across both TensorCores on v7x (megacore on v6e).
        half = -(-b // 2)          # ceil(b / 2)
        half = -(-half // 8) * 8   # round up to a multiple of 8
        tile_b = min(tile_b, half)
    if tile_b >= b:
        tile_b = b  # single block; block_shape == full array dims is always legal

    num_blocks = pl.cdiv(b, tile_b)
    has_tail = (b % tile_b) != 0

    # TODO(synk): add a vocab-scale (very large C) path that tiles the class
    # axis with a second "arbitrary" grid dim and an online logsumexp, instead
    # of letting tile_b collapse toward 8.

    kernel = functools.partial(
        _ce_label_smooth_kernel,
        epsilon=float(epsilon),
        num_classes=int(num_classes),
        batch_size=int(b),
        tile_b=int(tile_b),
        has_tail=bool(has_tail),
    )

    cost = pl.CostEstimate(
        flops=6 * b * c,
        transcendentals=b * c + b,
        bytes_accessed=b * c * itemsize + 4 * b + 4 * num_blocks,
    )

    # Scoped-VMEM limit covering the double-buffered inputs + working set,
    # with slack; capped at 48 MiB (safe on v7x's 64 MiB physical VMEM).
    footprint = tile_b * bytes_per_row + (2 << 20)
    vmem_limit = int(min(max(footprint, 16 << 20), 48 << 20))

    partials = pl.pallas_call(
        kernel,
        out_shape=jax.ShapeDtypeStruct((num_blocks, 1), jnp.float32),
        grid=(num_blocks,),
        in_specs=[
            pl.BlockSpec((tile_b, c), lambda i: (i, 0)),
            pl.BlockSpec((tile_b, 1), lambda i: (i, 0)),
        ],
        out_specs=pl.BlockSpec((1, 1), lambda i: (i, 0), memory_space=pltpu.SMEM),
        compiler_params=pltpu.CompilerParams(
            dimension_semantics=("parallel",),
            vmem_limit_bytes=vmem_limit,
        ),
        cost_estimate=cost,
    )(inputs, targets_2d)

    return jnp.sum(partials) / b


def _reference(inputs, targets, *, num_classes, epsilon=0.1):
    log_probs = jax.nn.log_softmax(inputs.astype(jnp.float32), axis=1)
    onehot = jax.nn.one_hot(targets, num_classes, dtype=jnp.float32)
    smoothed = (1.0 - epsilon) * onehot + epsilon / num_classes
    return (-smoothed * log_probs).mean(0).sum()


if __name__ == "__main__":
    key = jax.random.PRNGKey(0)
    k1, k2, k3, k4 = jax.random.split(key, 4)

    # Small shape consistent with the module (batch, num_classes).
    batch, num_classes = 8, 16
    inputs = jax.random.normal(k1, (batch, num_classes), dtype=jnp.float32)
    targets = jax.random.randint(k2, (batch,), 0, num_classes, dtype=jnp.int32)

    loss = cross_entropy_label_smooth(
        inputs, targets, num_classes=num_classes, epsilon=0.1
    )
    jax.block_until_ready(loss)
    ref = _reference(inputs, targets, num_classes=num_classes, epsilon=0.1)
    assert jnp.allclose(loss, ref, atol=1e-5, rtol=1e-5), (loss, ref)

    # Larger, non-divisible batch: exercises the tiled grid + tail masking.
    batch2, classes2 = 532, 384
    inputs2 = jax.random.normal(k3, (batch2, classes2), dtype=jnp.float32)
    targets2 = jax.random.randint(k4, (batch2,), 0, classes2, dtype=jnp.int32)
    loss2 = cross_entropy_label_smooth(
        inputs2, targets2, num_classes=classes2, epsilon=0.1, max_tile_rows=128
    )
    jax.block_until_ready(loss2)
    ref2 = _reference(inputs2, targets2, num_classes=classes2, epsilon=0.1)
    assert jnp.allclose(loss2, ref2, atol=1e-4, rtol=1e-4), (loss2, ref2)

    # bf16 ingestion path (halves HBM traffic; compute stays f32 in-kernel).
    inputs2_bf16 = inputs2.astype(jnp.bfloat16)
    loss3 = cross_entropy_label_smooth(
        inputs2_bf16, targets2, num_classes=classes2, epsilon=0.1
    )
    jax.block_until_ready(loss3)
    ref3 = _reference(inputs2_bf16, targets2, num_classes=classes2, epsilon=0.1)
    assert jnp.allclose(loss3, ref3, atol=1e-4, rtol=1e-4), (loss3, ref3)

    print("KERNEL_OK")
</pallas_src>

<mosaic_0001>
module attributes {stable_mosaic.version = 11 : i64} {
  func.func @_ce_label_smooth_kernel(%arg0: i32, %arg1: memref<8x16xf32, #tpu.memory_space<vmem>>, %arg2: memref<8x1xi32, #tpu.memory_space<vmem>>, %arg3: memref<1x1xf32, #tpu.memory_space<smem>>) attributes {dimension_semantics = [#tpu.dimension_semantics<parallel>], iteration_bounds = array<i64: 1>, scalar_prefetch = 0 : i64, scratch_operands = 0 : i64, tpu.core_type = #tpu.core_type<tc>, window_params = [{transform_indices = @transform_0, window_bounds = array<i64: 8, 16>}, {transform_indices = @transform_1, window_bounds = array<i64: 8, 1>}, {transform_indices = @transform_2, window_bounds = array<i64: 1, 1>}]} {
    %c0 = arith.constant 0 : index
    %c0_0 = arith.constant 0 : index
    %0 = vector.load %arg1[%c0, %c0_0] : memref<8x16xf32, #tpu.memory_space<vmem>>, vector<8x16xf32>
    %cst = arith.constant dense<0xFF800000> : vector<8xf32>
    %1 = vector.multi_reduction <maximumf>, %0, %cst [1] : vector<8x16xf32> to vector<8xf32>
    %2 = vector.shape_cast %1 : vector<8xf32> to vector<8x1xf32>
    %3 = vector.broadcast %2 : vector<8x1xf32> to vector<8x16xf32>
    %4 = arith.subf %0, %3 : vector<8x16xf32>
    %5 = math.exp %4 : vector<8x16xf32>
    %cst_1 = arith.constant dense<0.000000e+00> : vector<8xf32>
    %6 = vector.multi_reduction <add>, %5, %cst_1 [1] : vector<8x16xf32> to vector<8xf32>
    %7 = vector.shape_cast %6 : vector<8xf32> to vector<8x1xf32>
    %8 = math.log %7 : vector<8x1xf32>
    %9 = arith.addf %2, %8 : vector<8x1xf32>
    %10 = tpu.iota {dimensions = array<i32: 1>} : vector<8x16xi32>
    %c0_2 = arith.constant 0 : index
    %c0_3 = arith.constant 0 : index
    %11 = vector.load %arg2[%c0_2, %c0_3] : memref<8x1xi32, #tpu.memory_space<vmem>>, vector<8x1xi32>
    %12 = vector.broadcast %11 : vector<8x1xi32> to vector<8x16xi32>
    %13 = arith.cmpi eq, %10, %12 : vector<8x16xi32>
    %cst_4 = arith.constant 9.062500e-01 : f32
    %cst_5 = arith.constant 6.250000e-03 : f32
    %14 = vector.broadcast %cst_4 : f32 to vector<8x16xf32>
    %15 = vector.broadcast %cst_5 : f32 to vector<8x16xf32>
    %16 = arith.select %13, %14, %15 : vector<8x16xi1>, vector<8x16xf32>
    %17 = arith.mulf %16, %0 : vector<8x16xf32>
    %cst_6 = arith.constant dense<0.000000e+00> : vector<8xf32>
    %18 = vector.multi_reduction <add>, %17, %cst_6 [1] : vector<8x16xf32> to vector<8xf32>
    %19 = vector.shape_cast %18 : vector<8xf32> to vector<8x1xf32>
    %20 = arith.subf %9, %19 : vector<8x1xf32>
    %21 = vector.shape_cast %20 : vector<8x1xf32> to vector<1x8x1xf32>
    %cst_7 = arith.constant dense<0.000000e+00> : vector<1xf32>
    %22 = vector.multi_reduction <add>, %21, %cst_7 [1, 2] : vector<1x8x1xf32> to vector<1xf32>
    %23 = vector.shape_cast %22 : vector<1xf32> to vector<1x1x1xf32>
    %24 = vector.extract %23[0, 0, 0] : f32 from vector<1x1x1xf32>
    %c0_8 = arith.constant 0 : index
    %c0_9 = arith.constant 0 : index
    %25 = memref.load %arg3[%c0_8, %c0_9] : memref<1x1xf32, #tpu.memory_space<smem>>
    memref.store %24, %arg3[%c0_8, %c0_9] : memref<1x1xf32, #tpu.memory_space<smem>>
    return
  }
  func.func @transform_0(%arg0: i32) -> (i32, i32) {
    %c0_i32 = arith.constant 0 : i32
    %c0_i32_0 = arith.constant 0 : i32
    return %arg0, %c0_i32 : i32, i32
  }
  func.func @transform_1(%arg0: i32) -> (i32, i32) {
    %c0_i32 = arith.constant 0 : i32
    %c0_i32_0 = arith.constant 0 : i32
    return %arg0, %c0_i32 : i32, i32
  }
  func.func @transform_2(%arg0: i32) -> (i32, i32) {
    %c0_i32 = arith.constant 0 : i32
    %c0_i32_0 = arith.constant 0 : i32
    return %arg0, %c0_i32 : i32, i32
  }
}

</mosaic_0001>

<bundles_post_ra>
// kernel: tpu_custom_call.1
= control target key start
LH: loop header
LB: loop body
LE: loop exit
PB: predicated region body
PF: predicated region fallthrough
CT: control target
= control target key end

     0   :  { %vm13_vm0 = vcmask 130048   ;;  %s121_s0 = inlined_call_operand.vmem [shape: f32[8,16], index: 0, kind: input, shape index: {}]   ;;  %s122_s1 = inlined_call_operand.vmem [shape: s32[8,1], index: 1, kind: input, shape index: {}]   ;;  %s123_s2 = inlined_call_operand.hbm [shape: f32[1,1], index: 2, kind: output, shape index: {}]  }
   0x1   :  { %v12_v0 = vld [vmem:[%s121_s0] sm:$0xff] }
   0x2   :  { %7 = vsyncpa [#allocation3], 0  ;;  %v14_v1 = vsel %vm13_vm0, %v12_v0, -inf  ;;  %v91_v2 = vmov 0   ;;  %v28_v3 = vld [vmem:[%s122_s1] sm:$0xff]  ;;  %v26_v9 = vlaneseq  ;;  %vm39_vm2 = vcmask 7168  }
   0x3   :  { %72 = vset.pattern.permute.xlu0 %v91_v2  ;;  %v92_v12 = vmov 0.00625   ;;  %s57_s13 = sshll.u32 %s123_s2, 4  ;;  %s93_s15 = smov [#allocation2]   ;;  %s58_s13 = int_to_ptr.hbm [resolvable:$true] %s57_s13 }
   0x4   :  { %15 = vmax.xlane.f32.xlu0 %v14_v1  ;;  %v27_v10 = vand.u32 127, %v26_v9 }
  0x18   :  { %30 = vperm.xlu0 %72, %v28_v3  }
  0x77   :  { %v16_v4 = vpop.xlane.xlu0 %15 }
  0x78   :  { %v17_v5 = vsub.f32 %v12_v0, %v16_v4 }
  0x7a   :  { %v18_v6 = vmul.f32 1.442695, %v17_v5 }
  0x7c   :  { %73 = vpow2.f32 %v18_v6 }
  0x82   :  { %v74_v7 = vpop.eup %73 }
  0x83   :  { %v20_v8 = vsel %vm13_vm0, %v74_v7, 0.0 }
  0x84   :  { %21 = vadd.xlane.f32.xlu1 %v20_v8 }
  0x8a   :  { %v31_v11 = vpop.permute.xlu0 %30 }
  0x8b   :  { %vm32_vm1 = vcmp.eq.s32.totalorder %v27_v10, %v31_v11 }
  0x8c   :  { %v33_v13 = vsel %vm32_vm1, 0.90625, %v92_v12 }
  0x8d   :  { %v34_v14 = vmul.f32 %v33_v13, %v12_v0 }
  0x8f   :  { %v35_v15 = vsel %vm13_vm0, %v34_v14, 0.0 }
  0x90   :  { %36 = vadd.xlane.f32.xlu1 %v35_v15 }
  0xf7   :  { %v22_v16 = vpop.xlane.xlu1 %21 }
  0xf8   :  { %75 = vlog2.f32 %v22_v16 }
  0xfe   :  { %v76_v17 = vpop.eup %75 }
  0xff   :  { %v24_v18 = vmul.f32 0.6931472, %v76_v17 }
 0x101   :  { %v25_v19 = vadd.f32 %v24_v18, %v16_v4 }
 0x103   :  { %v37_v20 = vpop.xlane.xlu1 %36 }
 0x104   :  { %v38_v21 = vsub.f32 %v25_v19, %v37_v20 }
 0x106   :  { %v40_v22 = vsel %vm39_vm2, %v38_v21, 0.0 }
 0x107   :  { %41 = vadd.xlane.f32.xlu2 %v40_v22 }
 0x17a   :  { %v42_v23 = vpop.xlane.xlu2 %41 }
 0x17b   :  { %v43_v24 = vrot.slane %v42_v23, 4 }
 0x17d   :  { %v44_v25 = vadd.f32 %v43_v24, %v42_v23 }
 0x17f   :  { %v45_v26 = vrot.slane %v44_v25, 2 }
 0x181   :  { %v46_v27 = vadd.f32 %v45_v26, %v44_v25 }
 0x183   :  { %v47_v28 = vrot.slane %v46_v27, 1 }
 0x185   :  { %v48_v29 = vadd.f32 %v47_v28, %v46_v27 }
 0x187   :  { %67 = vpush %v48_v29 }
 0x1b8   :  { %s68_s14 = spop %67 }
 0x1b9   :  { %51 = sst [smem:[#allocation2]] %s68_s14 }
 0x1ba   :  { %60 = dma.smem_to_hbm %s93_s15, 16, %s58_s13, [#allocation3]  }
 0x1bb   :  { %89 = dma.done.wait [#allocation3], 16  }
 0x1bc   :  { %90 = vsyncadd [#allocation3], 4294967280 }
 0x1bd   :  { %65 = sfence }
 0x1be   :  { %66 = vsyncpa [#allocation3], 1 }

</bundles_post_ra>
